<compile_context>
chip_gen: v7x
topology: tpu7x:2x2x1
jax: 0.10.0
libtpu: 0.0.40
codegen_flags: <defaults>
</compile_context>

<pallas_src>
import functools

import numpy as np
import jax
import jax.numpy as jnp
from jax import lax
from jax.experimental import pallas as pl
from jax.experimental.pallas import tpu as pltpu

_LANES = 128  # vreg lane width: last dim of every tile


def _make_binarize_kernel(tr, hw):
    """Binarize + fused per-image hit-count kernel.

    tr: rows per block (static). hw: true number of pixels per image (static).
    """
    # Mask is only needed if some block elements fall outside the real image
    # (lane padding of the last row, or a partial last row-block).
    mask_needed = (hw % (tr * _LANES)) != 0

    def kernel(thr_ref, x_ref, ind_ref, cnt_ref):
        t = pl.program_id(1)
        thr = thr_ref[0, 0]

        # indicator = 1 - clamp(floor(x / thr), 0, 1)  ==  (x < thr) for real x.
        # (Exact rewrite; only divergence: NaN inputs / the alpha==0, x==0 case
        #  map to 0 instead of propagating NaN.)
        hit = x_ref[...].astype(jnp.float32) < thr          # (tr, 128) bool
        ind_ref[...] = hit.astype(ind_ref.dtype)

        # Fused per-image hit count: accumulator output block resident across t.
        @pl.when(t == 0)
        def _init():
            cnt_ref[...] = jnp.zeros_like(cnt_ref)

        hit_i32 = hit.astype(jnp.int32)
        if mask_needed:
            # Exclude elements past the real image extent from the counts.
            base = t * (tr * _LANES)
            rows = lax.broadcasted_iota(jnp.int32, (tr, _LANES), 0)
            lanes = lax.broadcasted_iota(jnp.int32, (tr, _LANES), 1)
            hit_i32 = jnp.where(base + rows * _LANES + lanes < hw, hit_i32, 0)

        # Per-lane partial counts (cross-sublane reduce; plenty of XLU slack in a
        # DMA-bound kernel).  Final (B,)-reduction over 128 lanes happens outside.
        cnt_ref[...] += jnp.sum(hit_i32, axis=0, keepdims=True)

    return kernel


@functools.partial(jax.jit, static_argnames=("tile_rows", "out_dtype"))
def _binarize_device(maps, thr_arr, tile_rows=4096, out_dtype=jnp.float32):
    B, H, W = maps.shape
    hw = H * W
    R = -(-hw // _LANES)                       # lane-dense rows per image

    tile_rows = max(8, (int(tile_rows) // 8) * 8)
    tr = R if R <= tile_rows else tile_rows    # full-extent block when it fits
    num_t = -(-R // tr)

    flat = maps.reshape(B, hw)
    if R * _LANES != hw:
        # Only the per-image lane remainder is padded (value irrelevant: counts
        # are masked in-kernel; the padded indicator columns are stripped below).
        flat = jnp.pad(flat, ((0, 0), (0, R * _LANES - hw)))
    x3d = flat.reshape(B, R, _LANES)           # layout-preserving when no pad

    # Explicit VMEM budget: double-buffered in+out tiles plus headroom.  Never
    # request all of v7x's 64 MiB per-core VMEM.
    xb = jnp.dtype(maps.dtype).itemsize
    ib = jnp.dtype(out_dtype).itemsize
    blk_bytes = tr * _LANES * (xb + ib)
    vmem_limit = int(min(48 << 20, max(16 << 20, 2 * blk_bytes + (4 << 20))))

    kernel = _make_binarize_kernel(tr, hw)

    ind3d, cnt3d = pl.pallas_call(
        kernel,
        out_shape=(
            jax.ShapeDtypeStruct((B, R, _LANES), out_dtype),
            jax.ShapeDtypeStruct((B, 1, _LANES), jnp.int32),
        ),
        grid_spec=pl.GridSpec(
            grid=(B, num_t),
            in_specs=[
                # Threshold as an SMEM scalar -> no recompile when alpha changes.
                pl.BlockSpec(memory_space=pltpu.MemorySpace.SMEM),
                pl.BlockSpec((None, tr, _LANES), lambda b, t: (b, t, 0)),
            ],
            out_specs=(
                pl.BlockSpec((None, tr, _LANES), lambda b, t: (b, t, 0)),
                # Same block index across t -> per-image count accumulator.
                pl.BlockSpec((None, 1, _LANES), lambda b, t: (b, 0, 0)),
            ),
        ),
        compiler_params=pltpu.CompilerParams(
            # Image axis shards across v7x's 2 TensorCores; count-accumulator
            # axis must stay "arbitrary".
            dimension_semantics=("parallel", "arbitrary"),
            vmem_limit_bytes=vmem_limit,
        ),
    )(thr_arr, x3d)

    counts = jnp.sum(cnt3d, axis=(1, 2))       # (B,) int32, tiny
    if R * _LANES != hw:
        indicator = ind3d.reshape(B, R * _LANES)[:, :hw].reshape(B, H, W)
    else:
        indicator = ind3d.reshape(B, H, W)     # free reshape
    return indicator, counts


def binarization_forward(binarization_maps, alpha, *, tile_rows=4096,
                         out_dtype=jnp.float32):
    """Pallas forward: returns (indicator_maps [B,H,W], nuc list-of-lists)."""
    thr_arr = jnp.asarray([[255.0 * float(alpha)]], dtype=jnp.float32)
    indicator, counts = _binarize_device(
        binarization_maps, thr_arr, tile_rows=tile_rows, out_dtype=out_dtype)

    # Host path: fetch the tiny counts first; only non-empty images pay a D2H,
    # and only as a 1 byte/pixel bool mask (no full-batch / f32 transfer).
    # TODO(synk): nuc has data-dependent ragged shape; no fixed-shape Pallas equivalent.
    counts_np = np.asarray(counts)
    B = binarization_maps.shape[0]
    nuc = []
    for n in range(B):
        if int(counts_np[n]) == 0:
            nuc.append([])
        else:
            m = np.asarray(indicator[n] > 0)
            coords = np.argwhere(m)
            nuc.append([(int(i), int(j)) for i, j in coords])
    return indicator, nuc


if __name__ == "__main__":
    key = jax.random.PRNGKey(0)

    def _reference(maps_np, alpha):
        thr = 255.0 * alpha
        ind = 1.0 - np.clip(np.floor(maps_np / thr), 0.0, 1.0)
        nuc_ref = []
        for n in range(maps_np.shape[0]):
            ii, jj = np.nonzero(ind[n] > 0)
            nuc_ref.append(list(zip(ii.tolist(), jj.tolist())))
        return ind, nuc_ref

    k1, k2 = jax.random.split(key)

    # Case 1: H*W multiple of 128 -> zero-copy fast path.
    maps1 = jax.random.uniform(k1, (2, 16, 16), dtype=jnp.float32,
                               minval=0.0, maxval=255.0)
    ind1, nuc1 = binarization_forward(maps1, 0.5)
    ind1 = jax.block_until_ready(ind1)
    ref_ind1, ref_nuc1 = _reference(np.asarray(maps1), 0.5)
    assert np.allclose(np.asarray(ind1), ref_ind1), "indicator mismatch (case 1)"
    assert nuc1 == ref_nuc1, "nuc mismatch (case 1)"

    # Case 2: H*W not a multiple of 128 -> exercises the in-kernel validity mask.
    maps2 = jax.random.uniform(k2, (2, 10, 10), dtype=jnp.float32,
                               minval=0.0, maxval=255.0)
    ind2, nuc2 = binarization_forward(maps2, 0.25)
    ind2 = jax.block_until_ready(ind2)
    ref_ind2, ref_nuc2 = _reference(np.asarray(maps2), 0.25)
    assert np.allclose(np.asarray(ind2), ref_ind2), "indicator mismatch (case 2)"
    assert nuc2 == ref_nuc2, "nuc mismatch (case 2)"

    print("KERNEL_OK")
</pallas_src>

<mosaic_0001>
module attributes {stable_mosaic.version = 11 : i64} {
  func.func @kernel(%arg0: i32, %arg1: i32, %arg2: memref<1x1xf32, #tpu.memory_space<smem>>, %arg3: memref<1x2x128xf32, #tpu.memory_space<vmem>>, %arg4: memref<1x2x128xf32, #tpu.memory_space<vmem>>, %arg5: memref<1x1x128xi32, #tpu.memory_space<vmem>>) attributes {dimension_semantics = [#tpu.dimension_semantics<parallel>, #tpu.dimension_semantics<arbitrary>], iteration_bounds = array<i64: 2, 1>, scalar_prefetch = 0 : i64, scratch_operands = 0 : i64, tpu.core_type = #tpu.core_type<tc>, window_params = [{transform_indices = @transform_0, window_bounds = array<i64: 1, 1>}, {transform_indices = @transform_1, window_bounds = array<i64: 1, 2, 128>}, {transform_indices = @transform_2, window_bounds = array<i64: 1, 2, 128>}, {transform_indices = @transform_3, window_bounds = array<i64: 1, 1, 128>}]} {
    %c0 = arith.constant 0 : index
    %c0_0 = arith.constant 0 : index
    %0 = memref.load %arg2[%c0, %c0_0] : memref<1x1xf32, #tpu.memory_space<smem>>
    %c0_1 = arith.constant 0 : index
    %c0_2 = arith.constant 0 : index
    %c0_3 = arith.constant 0 : index
    %1 = vector.load %arg3[%c0_1, %c0_2, %c0_3] : memref<1x2x128xf32, #tpu.memory_space<vmem>>, vector<1x2x128xf32>
    %2 = vector.shape_cast %1 : vector<1x2x128xf32> to vector<2x128xf32>
    %3 = vector.broadcast %0 : f32 to vector<2x128xf32>
    %4 = arith.cmpf olt, %2, %3 : vector<2x128xf32>
    %5 = arith.extui %4 : vector<2x128xi1> to vector<2x128xi32>
    %6 = arith.sitofp %5 : vector<2x128xi32> to vector<2x128xf32>
    %c0_4 = arith.constant 0 : index
    %c0_5 = arith.constant 0 : index
    %c0_6 = arith.constant 0 : index
    %7 = vector.load %arg4[%c0_4, %c0_5, %c0_6] : memref<1x2x128xf32, #tpu.memory_space<vmem>>, vector<1x2x128xf32>
    %8 = vector.shape_cast %7 : vector<1x2x128xf32> to vector<2x128xf32>
    %9 = vector.shape_cast %6 : vector<2x128xf32> to vector<1x2x128xf32>
    tpu.vector_store %arg4[%c0_4, %c0_5, %c0_6], %9 {strides = array<i32>} : memref<1x2x128xf32, #tpu.memory_space<vmem>>, vector<1x2x128xf32>,
    %c0_i32 = arith.constant 0 : i32
    %10 = arith.cmpi eq, %arg1, %c0_i32 : i32
    %11 = arith.extui %10 : i1 to i32
    %c0_i32_7 = arith.constant 0 : i32
    %12 = arith.cmpi ne, %11, %c0_i32_7 : i32
    scf.if %12 {
      %c0_i32_14 = arith.constant 0 : i32
      %22 = vector.broadcast %c0_i32_14 : i32 to vector<1x128xi32>
      %c0_15 = arith.constant 0 : index
      %c0_16 = arith.constant 0 : index
      %c0_17 = arith.constant 0 : index
      %23 = vector.load %arg5[%c0_15, %c0_16, %c0_17] : memref<1x1x128xi32, #tpu.memory_space<vmem>>, vector<1x1x128xi32>
      %24 = vector.shape_cast %23 : vector<1x1x128xi32> to vector<1x128xi32>
      %25 = vector.shape_cast %22 : vector<1x128xi32> to vector<1x1x128xi32>
      tpu.vector_store %arg5[%c0_15, %c0_16, %c0_17], %25 {strides = array<i32>} : memref<1x1x128xi32, #tpu.memory_space<vmem>>, vector<1x1x128xi32>,
    } else {
    }
    %13 = arith.extui %4 : vector<2x128xi1> to vector<2x128xi32>
    %c0_8 = arith.constant 0 : index
    %c0_9 = arith.constant 0 : index
    %c0_10 = arith.constant 0 : index
    %14 = vector.load %arg5[%c0_8, %c0_9, %c0_10] : memref<1x1x128xi32, #tpu.memory_space<vmem>>, vector<1x1x128xi32>
    %15 = vector.shape_cast %14 : vector<1x1x128xi32> to vector<1x128xi32>
    %cst = arith.constant dense<0> : vector<128xi32>
    %16 = vector.multi_reduction <add>, %13, %cst [0] : vector<2x128xi32> to vector<128xi32>
    %17 = vector.shape_cast %16 : vector<128xi32> to vector<1x128xi32>
    %18 = arith.addi %15, %17 : vector<1x128xi32>
    %c0_11 = arith.constant 0 : index
    %c0_12 = arith.constant 0 : index
    %c0_13 = arith.constant 0 : index
    %19 = vector.load %arg5[%c0_11, %c0_12, %c0_13] : memref<1x1x128xi32, #tpu.memory_space<vmem>>, vector<1x1x128xi32>
    %20 = vector.shape_cast %19 : vector<1x1x128xi32> to vector<1x128xi32>
    %21 = vector.shape_cast %18 : vector<1x128xi32> to vector<1x1x128xi32>
    tpu.vector_store %arg5[%c0_11, %c0_12, %c0_13], %21 {strides = array<i32>} : memref<1x1x128xi32, #tpu.memory_space<vmem>>, vector<1x1x128xi32>,
    return
  }
  func.func @transform_0(%arg0: i32, %arg1: i32) -> (i32, i32) {
    %c0_i32 = arith.constant 0 : i32
    %c0_i32_0 = arith.constant 0 : i32
    %c0_i32_1 = arith.constant 0 : i32
    return %c0_i32, %c0_i32_0 : i32, i32
  }
  func.func @transform_1(%arg0: i32, %arg1: i32) -> (i32, i32, i32) {
    %c0_i32 = arith.constant 0 : i32
    %c0_i32_0 = arith.constant 0 : i32
    return %arg0, %arg1, %c0_i32 : i32, i32, i32
  }
  func.func @transform_2(%arg0: i32, %arg1: i32) -> (i32, i32, i32) {
    %c0_i32 = arith.constant 0 : i32
    %c0_i32_0 = arith.constant 0 : i32
    return %arg0, %arg1, %c0_i32 : i32, i32, i32
  }
  func.func @transform_3(%arg0: i32, %arg1: i32) -> (i32, i32, i32) {
    %c0_i32 = arith.constant 0 : i32
    %c0_i32_0 = arith.constant 0 : i32
    %c0_i32_1 = arith.constant 0 : i32
    return %arg0, %c0_i32, %c0_i32_0 : i32, i32, i32
  }
}

</mosaic_0001>

<bundles_post_ra>
// kernel: _binarize_device.1
= control target key start
LH: loop header
LB: loop body
LE: loop exit
PB: predicated region body
PF: predicated region fallthrough
CT: control target
= control target key end

     0   :  { %s414_s14 = smov 0   ;;  %s416_s15 = smov 0   ;;  %s450_s0 = inlined_call_operand.<no memory space> [shape: f32[1,1], index: 0, kind: input, shape index: {}]   ;;  %s451_s1 = inlined_call_operand.vmem [shape: f32[2,2,128], index: 1, kind: input, shape index: {}]   ;;  %s452_s2 = inlined_call_operand.vmem [shape: f32[2,2,128], index: 2, kind: output, shape index: {0}]   ;;  %s453_s3 = inlined_call_operand.vmem [shape: s32[2,1,128], index: 3, kind: output, shape index: {1}]  }
   0x1   :  { %9 = sst [smem:[#allocation2]] %s450_s0  ;;  %s418_s16 = smov 0  }
   0x2 LB: > { %s27_s0 = sadd.s32 1, %s383_s15  ;;  %p333_p0 = scmp.ge.s32.totalorder %s387_s16, 1  ;;  %s387_s16 = sphi %s418_s16, %s15_s16   ;;  %s383_s15 = sphi %s416_s15, %s455_s15   ;;  %s379_s14 = sphi %s414_s14, %s454_s14  }
   0x3   : > { %p29_p1 = scmp.ge.s32.totalorder %s27_s0, 2  ;;  %p159_p2 = scmp.lt.s32.totalorder %s387_s16, 3 }
   0x5   : > { %s457_s0 = smov (%p29_p1, %s27_s0), 0  ;;  %p160_p3 = pnand %p333_p0, %p159_p2 }
   0x6   : > { %p190_p4 = scmp.lt.s32.totalorder (!%p160_p3), %s379_s14, 1  ;;  %s207_s17 = sld [smem:[#allocation2]] (!%p160_p3)  ;;  %v389_v0 = vmov (!%p160_p3), 0   ;;  %vm220_vm0 = vcmask (!%p160_p3), 1041408   ;;  %v390_v4 = vmov (!%p160_p3), 0.0  }
   0x7   : > { %163 = sbr.rel (%p160_p3) target bundleno = 36 (0x24), region = 28 }
   0xc   : > { %v209_v2 = vstv (!%p160_p3), %s207_s17 }
   0xe   : > { %s459_s14 = smov (!%p190_p4, %s379_s14), 1 }
   0xf   : > { %s334_s18 = sshll.u32 %s459_s14, 1  ;;  %s206_s21 = scalar_lea.vmem %s453_s3, %s459_s14 }
  0x10   : > { %s196_s24 = scalar_lea.vmem %s451_s1, %s334_s18  ;;  %218 = vst [vmem:[%s206_s21] sm:$0x1] %v389_v0  ;;  %s203_s27 = scalar_lea.vmem %s452_s2, %s334_s18 }
  0x11   : > { %v208_v1 = vld [vmem:[%s196_s24] sm:$0x3] }
  0x12   : > { %vm210_vm1 = vcmp.lt.f32.partialorder %v208_v1, %v209_v2 }
  0x13   : > { %v211_v3 = vsel %vm210_vm1, 1, %v389_v0  ;;  %v336_v5 = vsel %vm210_vm1, 1.0, %v390_v4 }
  0x14   : > { %v221_v6 = vsel %vm220_vm0, %v211_v3, 0  ;;  %213 = vst [vmem:[%s203_s27] sm:$0x3] %v336_v5 }
  0x15   : > { %v222_v7 = vrot.slane %v221_v6, 4 }
  0x17   : > { %v223_v8 = vadd.s32 %v222_v7, %v221_v6  ;;  %v219_v12 = vld [vmem:[%s206_s21] sm:$0x1] }
  0x19   : > { %v224_v9 = vrot.slane %v223_v8, 2 }
  0x1b   : > { %v225_v10 = vadd.s32 %v224_v9, %v223_v8 }
  0x1d   : > { %v226_v11 = vrot.slane %v225_v10, 1 }
  0x1f   : > { %v227_v13 = vadd.s32 %v226_v11, %v225_v10 }
  0x21   : > { %v228_v14 = vadd.s32 %v227_v13, %v219_v12 }
  0x23   : > { %229 = vst [vmem:[%s206_s21] sm:$0x1] %v228_v14 }
  0x24 PF: > { %s15_s16 = sadd.s32 1, %s387_s16   ;;  %s454_s14 = smov %s383_s15 }
  0x25   : > { %p12_p5 = scmp.ge.s32.totalorder %s15_s16, 4   ;;  %s455_s15 = smov %s457_s0 }
  0x27   :  { %14 = sbr.rel (!%p12_p5) target bundleno = 2 (0x2), region = 74 }

</bundles_post_ra>
